<compile_context>
chip_gen: v7x
topology: tpu7x:2x2x1
jax: 0.10.0
libtpu: 0.0.40
codegen_flags: <defaults>
</compile_context>

<pallas_src>
import functools
import math

import jax
import jax.numpy as jnp
from jax.experimental import pallas as pl
from jax.experimental.pallas import tpu as pltpu


def _layernorm(v, gamma, beta, eps=1e-5):
    # PyTorch LayerNorm: biased variance over the last dim, f32 math.
    mu = jnp.mean(v, axis=-1, keepdims=True)
    var = jnp.mean((v - mu) ** 2, axis=-1, keepdims=True)
    return (v - mu) * jax.lax.rsqrt(var + eps) * gamma + beta


def _lm_layer_kernel(
    x_ref,      # (1, S, D)  current batch element
    wqkv_ref,   # (D, 3D)    pre-transposed; q-part pre-scaled by 1/sqrt(hd)
    bqkv_ref,   # (1, 3D)    f32; q-part pre-scaled
    wo3_ref,    # (nhead, hd, D)  out-projection, head-major (merge folded in)
    w1_ref,     # (D, F)
    b1_ref,     # (1, F)     f32
    w2_ref,     # (F, D)
    vec_ref,    # (6, D)     f32 rows: bo, b2, g1, be1, g2, be2
    o_ref,      # (1, S, D)
    *, nhead, approx_softmax,
):
    x = x_ref[...].reshape(x_ref.shape[1], x_ref.shape[2]).astype(jnp.float32)
    S, D = x.shape
    hd = D // nhead
    cdt = wqkv_ref.dtype          # MXU operand dtype (bf16 fast / f32 precise)

    # --- fused Q/K/V projection: one MXU matmul, f32 accumulation ------------
    qkv = jnp.dot(x.astype(cdt), wqkv_ref[...],
                  preferred_element_type=jnp.float32) + bqkv_ref[...]
    qkv_c = qkv.astype(cdt)

    # Head split: O(nhead) lane slices into a head-major (nhead, S, hd) batch.
    def split_heads(off):
        return jnp.stack(
            [qkv_c[:, off + h * hd: off + (h + 1) * hd] for h in range(nhead)],
            axis=0)

    qh = split_heads(0 * D)
    kh = split_heads(1 * D)
    vh = split_heads(2 * D)

    # --- batched multi-head attention (heads in the leading batch dim) -------
    s = jnp.einsum("hqd,hkd->hqk", qh, kh, preferred_element_type=jnp.float32)
    s = s - jnp.max(s, axis=-1, keepdims=True)
    p = jnp.exp(s)
    p = p * pl.reciprocal(jnp.sum(p, axis=-1, keepdims=True),
                          approx=approx_softmax)
    ctx_h = jnp.einsum("hqk,hkd->hqd", p.astype(cdt), vh,
                       preferred_element_type=jnp.float32)   # (nhead, S, hd)
    ctx_c = ctx_h.astype(cdt)

    # --- head merge folded into the out-projection ---------------------------
    # attn = sum_h ctx_h[h] @ wo.T[h*hd:(h+1)*hd, :]  -> pure MXU, no concat.
    wo3 = wo3_ref[...]
    attn = jnp.dot(ctx_c[0], wo3[0], preferred_element_type=jnp.float32)
    for h in range(1, nhead):
        attn = attn + jnp.dot(ctx_c[h], wo3[h],
                              preferred_element_type=jnp.float32)
    attn = attn + vec_ref[0:1, :]

    # --- attention sublayer: residual + LayerNorm1 ---------------------------
    z = _layernorm(x + attn, vec_ref[2:3, :], vec_ref[3:4, :])

    # --- feed-forward sublayer (dropouts identity at inference) --------------
    h1 = jnp.maximum(
        jnp.dot(z.astype(cdt), w1_ref[...],
                preferred_element_type=jnp.float32) + b1_ref[...], 0.0)
    ff = jnp.dot(h1.astype(cdt), w2_ref[...],
                 preferred_element_type=jnp.float32) + vec_ref[1:2, :]

    # --- top-level residual (against ORIGINAL x) + final LayerNorm -----------
    y = _layernorm(x + ff, vec_ref[4:5, :], vec_ref[5:6, :])
    o_ref[...] = y.reshape(1, S, D).astype(o_ref.dtype)


def pack_params(params, *, nhead, compute_dtype=jnp.bfloat16):
    """One-time host packing: pre-transpose, fuse QKV, fold 1/sqrt(hd), cast."""
    D = params["wq"].shape[0]
    hd = D // nhead
    scale = 1.0 / math.sqrt(hd)
    wqkv = jnp.concatenate(
        [params["wq"].T * scale, params["wk"].T, params["wv"].T],
        axis=1).astype(compute_dtype)                                   # (D, 3D)
    bqkv = jnp.concatenate(
        [params["bq"] * scale, params["bk"], params["bv"]],
        axis=1).astype(jnp.float32)                                     # (1, 3D)
    wo3 = params["wo"].T.reshape(nhead, hd, D).astype(compute_dtype)    # (h,hd,D)
    w1t = params["w1"].T.astype(compute_dtype)                          # (D, F)
    w2t = params["w2"].T.astype(compute_dtype)                          # (F, D)
    b1 = params["b1"].astype(jnp.float32)                               # (1, F)
    vec = jnp.concatenate(
        [params["bo"], params["b2"], params["g1"], params["be1"],
         params["g2"], params["be2"]], axis=0).astype(jnp.float32)      # (6, D)
    return {"wqkv": wqkv, "bqkv": bqkv, "wo3": wo3, "w1": w1t, "b1": b1,
            "w2": w2t, "vec": vec}


@functools.partial(jax.jit, static_argnames=("nhead",))
def transformer_lm_layer(x, packed, *, nhead):
    """x: (B, S, D) float32, packed = pack_params(...). Returns (B, S, D) f32."""
    B, S, D = x.shape
    F = packed["w1"].shape[1]
    hd = D // nhead
    approx_softmax = bool(packed["wqkv"].dtype == jnp.bfloat16)

    weights = (packed["wqkv"], packed["bqkv"], packed["wo3"], packed["w1"],
               packed["b1"], packed["w2"], packed["vec"])

    def const_spec(a):
        nd = a.ndim
        return pl.BlockSpec(a.shape, lambda i, _nd=nd: (0,) * _nd)

    in_specs = [pl.BlockSpec((1, S, D), lambda i: (i, 0, 0))] + [
        const_spec(w) for w in weights]

    flops = 2 * B * S * (4 * D * D + 2 * D * F) + 4 * B * nhead * S * S * hd
    transcendentals = B * nhead * S * S + 4 * B * S
    bytes_accessed = int(
        2 * x.size * x.dtype.itemsize
        + sum(int(w.size) * w.dtype.itemsize for w in weights))

    kernel = functools.partial(_lm_layer_kernel, nhead=nhead,
                               approx_softmax=approx_softmax)
    return pl.pallas_call(
        kernel,
        out_shape=jax.ShapeDtypeStruct((B, S, D), jnp.float32),
        grid_spec=pltpu.PrefetchScalarGridSpec(
            num_scalar_prefetch=0,
            grid=(B,),
            in_specs=in_specs,
            out_specs=pl.BlockSpec((1, S, D), lambda i: (i, 0, 0)),
        ),
        compiler_params=pltpu.CompilerParams(
            dimension_semantics=("parallel",),
            vmem_limit_bytes=64 * 1024 * 1024,
        ),
        cost_estimate=pl.CostEstimate(
            flops=flops, transcendentals=transcendentals,
            bytes_accessed=bytes_accessed),
    )(x, *weights)


def reference(x, p, *, nhead):
    """Pure-JAX reference mirroring the PyTorch module (eval mode)."""
    B, S, D = x.shape
    hd = D // nhead

    def ln(v, g, b):
        mu = v.mean(-1, keepdims=True)
        var = ((v - mu) ** 2).mean(-1, keepdims=True)
        return (v - mu) / jnp.sqrt(var + 1e-5) * g + b

    q = (x @ p["wq"].T + p["bq"]).reshape(B, S, nhead, hd)
    k = (x @ p["wk"].T + p["bk"]).reshape(B, S, nhead, hd)
    v = (x @ p["wv"].T + p["bv"]).reshape(B, S, nhead, hd)
    s = jnp.einsum("bqhd,bkhd->bhqk", q, k) / jnp.sqrt(hd)
    a = jax.nn.softmax(s, axis=-1)
    ctx = jnp.einsum("bhqk,bkhd->bqhd", a, v).reshape(B, S, D)
    attn = ctx @ p["wo"].T + p["bo"]
    z = ln(x + attn, p["g1"], p["be1"])
    h1 = jax.nn.relu(z @ p["w1"].T + p["b1"])
    ff = h1 @ p["w2"].T + p["b2"]
    return ln(x + ff, p["g2"], p["be2"])


if __name__ == "__main__":
    d_model, nhead, dim_feedforward = 32, 4, 64
    B, S = 2, 8

    key = jax.random.PRNGKey(0)
    ks = jax.random.split(key, 17)
    sc = 0.1
    params = {
        # nn.MultiheadAttention in_proj (split into q/k/v) + out_proj
        "wq": sc * jax.random.normal(ks[0], (d_model, d_model), jnp.float32),
        "wk": sc * jax.random.normal(ks[1], (d_model, d_model), jnp.float32),
        "wv": sc * jax.random.normal(ks[2], (d_model, d_model), jnp.float32),
        "bq": sc * jax.random.normal(ks[3], (1, d_model), jnp.float32),
        "bk": sc * jax.random.normal(ks[4], (1, d_model), jnp.float32),
        "bv": sc * jax.random.normal(ks[5], (1, d_model), jnp.float32),
        "wo": sc * jax.random.normal(ks[6], (d_model, d_model), jnp.float32),
        "bo": sc * jax.random.normal(ks[7], (1, d_model), jnp.float32),
        # attention-sublayer LayerNorm
        "g1": 1.0 + sc * jax.random.normal(ks[8], (1, d_model), jnp.float32),
        "be1": sc * jax.random.normal(ks[9], (1, d_model), jnp.float32),
        # feed-forward: Linear(d_model->ff), Linear(ff->d_model)
        "w1": sc * jax.random.normal(ks[10], (dim_feedforward, d_model), jnp.float32),
        "b1": sc * jax.random.normal(ks[11], (1, dim_feedforward), jnp.float32),
        "w2": sc * jax.random.normal(ks[12], (d_model, dim_feedforward), jnp.float32),
        "b2": sc * jax.random.normal(ks[13], (1, d_model), jnp.float32),
        # top-level LayerNorm
        "g2": 1.0 + sc * jax.random.normal(ks[14], (1, d_model), jnp.float32),
        "be2": sc * jax.random.normal(ks[15], (1, d_model), jnp.float32),
    }
    x = jax.random.normal(ks[16], (B, S, d_model), jnp.float32)

    ref = reference(x, params, nhead=nhead)

    # Precise path (f32 MXU operands, exact softmax reciprocal): tight check.
    packed_f32 = pack_params(params, nhead=nhead, compute_dtype=jnp.float32)
    out_f32 = jax.block_until_ready(
        transformer_lm_layer(x, packed_f32, nhead=nhead))
    assert out_f32.shape == (B, S, d_model)
    err_f32 = float(jnp.abs(out_f32 - ref).max())
    assert jnp.allclose(out_f32, ref, atol=5e-4, rtol=5e-4), err_f32

    # Fast path (bf16 MXU operands, approx softmax reciprocal): perf mode.
    packed_bf16 = pack_params(params, nhead=nhead)  # bf16 weights (default)
    out_bf16 = jax.block_until_ready(
        transformer_lm_layer(x, packed_bf16, nhead=nhead))
    err_bf16 = float(jnp.abs(out_bf16 - ref).max())
    assert jnp.allclose(out_bf16, ref, atol=5e-2, rtol=5e-2), err_bf16

    print("KERNEL_OK")
</pallas_src>

<mosaic_0001>
module attributes {stable_mosaic.version = 11 : i64} {
  func.func @_lm_layer_kernel(%arg0: i32, %arg1: memref<1x8x32xf32, #tpu.memory_space<vmem>>, %arg2: memref<32x96xf32, #tpu.memory_space<vmem>>, %arg3: memref<1x96xf32, #tpu.memory_space<vmem>>, %arg4: memref<4x8x32xf32, #tpu.memory_space<vmem>>, %arg5: memref<32x64xf32, #tpu.memory_space<vmem>>, %arg6: memref<1x64xf32, #tpu.memory_space<vmem>>, %arg7: memref<64x32xf32, #tpu.memory_space<vmem>>, %arg8: memref<6x32xf32, #tpu.memory_space<vmem>>, %arg9: memref<1x8x32xf32, #tpu.memory_space<vmem>>) attributes {dimension_semantics = [#tpu.dimension_semantics<parallel>], iteration_bounds = array<i64: 2>, scalar_prefetch = 0 : i64, scratch_operands = 0 : i64, tpu.core_type = #tpu.core_type<tc>, window_params = [{transform_indices = @transform_0, window_bounds = array<i64: 1, 8, 32>}, {pipeline_mode = #tpu.pipeline_mode<synchronous>, transform_indices = @transform_1, window_bounds = array<i64: 32, 96>}, {pipeline_mode = #tpu.pipeline_mode<synchronous>, transform_indices = @transform_2, window_bounds = array<i64: 1, 96>}, {pipeline_mode = #tpu.pipeline_mode<synchronous>, transform_indices = @transform_3, window_bounds = array<i64: 4, 8, 32>}, {pipeline_mode = #tpu.pipeline_mode<synchronous>, transform_indices = @transform_4, window_bounds = array<i64: 32, 64>}, {pipeline_mode = #tpu.pipeline_mode<synchronous>, transform_indices = @transform_5, window_bounds = array<i64: 1, 64>}, {pipeline_mode = #tpu.pipeline_mode<synchronous>, transform_indices = @transform_6, window_bounds = array<i64: 64, 32>}, {pipeline_mode = #tpu.pipeline_mode<synchronous>, transform_indices = @transform_7, window_bounds = array<i64: 6, 32>}, {transform_indices = @transform_8, window_bounds = array<i64: 1, 8, 32>}]} {
    %c0 = arith.constant 0 : index
    %c0_0 = arith.constant 0 : index
    %c0_1 = arith.constant 0 : index
    %0 = vector.load %arg1[%c0, %c0_0, %c0_1] : memref<1x8x32xf32, #tpu.memory_space<vmem>>, vector<1x8x32xf32>
    %1 = vector.shape_cast %0 : vector<1x8x32xf32> to vector<8x32xf32>
    %c0_2 = arith.constant 0 : index
    %c0_3 = arith.constant 0 : index
    %2 = vector.load %arg2[%c0_2, %c0_3] : memref<32x96xf32, #tpu.memory_space<vmem>>, vector<32x96xf32>
    %cst = arith.constant dense<0.000000e+00> : vector<8x96xf32>
    %3 = tpu.matmul %1, %2, %cst {dimension_numbers = #tpu.dot_dimension_numbers<[1], [0], [0], [1], [0, 0, 1, 1], [], []>} : vector<8x32xf32>, vector<32x96xf32>, vector<8x96xf32> -> vector<8x96xf32>
    %c0_4 = arith.constant 0 : index
    %c0_5 = arith.constant 0 : index
    %4 = vector.load %arg3[%c0_4, %c0_5] : memref<1x96xf32, #tpu.memory_space<vmem>>, vector<1x96xf32>
    %5 = vector.broadcast %4 : vector<1x96xf32> to vector<8x96xf32>
    %6 = arith.addf %3, %5 : vector<8x96xf32>
    %7 = vector.extract_strided_slice %6 {offsets = [0, 0], sizes = [8, 8], strides = [1, 1]} : vector<8x96xf32> to vector<8x8xf32>
    %8 = vector.extract_strided_slice %6 {offsets = [0, 8], sizes = [8, 8], strides = [1, 1]} : vector<8x96xf32> to vector<8x8xf32>
    %9 = vector.extract_strided_slice %6 {offsets = [0, 16], sizes = [8, 8], strides = [1, 1]} : vector<8x96xf32> to vector<8x8xf32>
    %10 = vector.extract_strided_slice %6 {offsets = [0, 24], sizes = [8, 8], strides = [1, 1]} : vector<8x96xf32> to vector<8x8xf32>
    %11 = vector.shape_cast %7 : vector<8x8xf32> to vector<1x8x8xf32>
    %12 = vector.shape_cast %8 : vector<8x8xf32> to vector<1x8x8xf32>
    %13 = vector.shape_cast %9 : vector<8x8xf32> to vector<1x8x8xf32>
    %14 = vector.shape_cast %10 : vector<8x8xf32> to vector<1x8x8xf32>
    %15 = tpu.concatenate %11, %12, %13, %14 in 0 : vector<1x8x8xf32>, vector<1x8x8xf32>, vector<1x8x8xf32>, vector<1x8x8xf32> -> vector<4x8x8xf32>
    %16 = vector.extract_strided_slice %6 {offsets = [0, 32], sizes = [8, 8], strides = [1, 1]} : vector<8x96xf32> to vector<8x8xf32>
    %17 = vector.extract_strided_slice %6 {offsets = [0, 40], sizes = [8, 8], strides = [1, 1]} : vector<8x96xf32> to vector<8x8xf32>
    %18 = vector.extract_strided_slice %6 {offsets = [0, 48], sizes = [8, 8], strides = [1, 1]} : vector<8x96xf32> to vector<8x8xf32>
    %19 = vector.extract_strided_slice %6 {offsets = [0, 56], sizes = [8, 8], strides = [1, 1]} : vector<8x96xf32> to vector<8x8xf32>
    %20 = vector.shape_cast %16 : vector<8x8xf32> to vector<1x8x8xf32>
    %21 = vector.shape_cast %17 : vector<8x8xf32> to vector<1x8x8xf32>
    %22 = vector.shape_cast %18 : vector<8x8xf32> to vector<1x8x8xf32>
    %23 = vector.shape_cast %19 : vector<8x8xf32> to vector<1x8x8xf32>
    %24 = tpu.concatenate %20, %21, %22, %23 in 0 : vector<1x8x8xf32>, vector<1x8x8xf32>, vector<1x8x8xf32>, vector<1x8x8xf32> -> vector<4x8x8xf32>
    %25 = vector.extract_strided_slice %6 {offsets = [0, 64], sizes = [8, 8], strides = [1, 1]} : vector<8x96xf32> to vector<8x8xf32>
    %26 = vector.extract_strided_slice %6 {offsets = [0, 72], sizes = [8, 8], strides = [1, 1]} : vector<8x96xf32> to vector<8x8xf32>
    %27 = vector.extract_strided_slice %6 {offsets = [0, 80], sizes = [8, 8], strides = [1, 1]} : vector<8x96xf32> to vector<8x8xf32>
    %28 = vector.extract_strided_slice %6 {offsets = [0, 88], sizes = [8, 8], strides = [1, 1]} : vector<8x96xf32> to vector<8x8xf32>
    %29 = vector.shape_cast %25 : vector<8x8xf32> to vector<1x8x8xf32>
    %30 = vector.shape_cast %26 : vector<8x8xf32> to vector<1x8x8xf32>
    %31 = vector.shape_cast %27 : vector<8x8xf32> to vector<1x8x8xf32>
    %32 = vector.shape_cast %28 : vector<8x8xf32> to vector<1x8x8xf32>
    %33 = tpu.concatenate %29, %30, %31, %32 in 0 : vector<1x8x8xf32>, vector<1x8x8xf32>, vector<1x8x8xf32>, vector<1x8x8xf32> -> vector<4x8x8xf32>
    "tpu.trace_start"() <{level = 10 : i32, message = "hqd,hkd->hqk"}> : () -> ()
    %cst_6 = arith.constant dense<0.000000e+00> : vector<4x8x8xf32>
    %34 = tpu.matmul %15, %24, %cst_6 {dimension_numbers = #tpu.dot_dimension_numbers<[2], [2], [1], [1], [0, 0, 0, 1, 1, 1], [0], [0]>} : vector<4x8x8xf32>, vector<4x8x8xf32>, vector<4x8x8xf32> -> vector<4x8x8xf32>
    "tpu.trace_stop"() : () -> ()
    %cst_7 = arith.constant dense<0xFF800000> : vector<4x8xf32>
    %35 = vector.multi_reduction <maximumf>, %34, %cst_7 [2] : vector<4x8x8xf32> to vector<4x8xf32>
    %36 = vector.shape_cast %35 : vector<4x8xf32> to vector<4x8x1xf32>
    %37 = vector.broadcast %36 : vector<4x8x1xf32> to vector<4x8x8xf32>
    %38 = arith.subf %34, %37 : vector<4x8x8xf32>
    %39 = math.exp %38 : vector<4x8x8xf32>
    %cst_8 = arith.constant dense<0.000000e+00> : vector<4x8xf32>
    %40 = vector.multi_reduction <add>, %39, %cst_8 [2] : vector<4x8x8xf32> to vector<4x8xf32>
    %41 = vector.shape_cast %40 : vector<4x8xf32> to vector<4x8x1xf32>
    %42 = tpu.reciprocal %41 : vector<4x8x1xf32> -> vector<4x8x1xf32>
    %43 = vector.broadcast %42 : vector<4x8x1xf32> to vector<4x8x8xf32>
    %44 = arith.mulf %39, %43 : vector<4x8x8xf32>
    "tpu.trace_start"() <{level = 10 : i32, message = "hqk,hkd->hqd"}> : () -> ()
    %cst_9 = arith.constant dense<0.000000e+00> : vector<4x8x8xf32>
    %45 = tpu.matmul %44, %33, %cst_9 {dimension_numbers = #tpu.dot_dimension_numbers<[2], [1], [1], [2], [0, 0, 0, 1, 1, 2], [0], [0]>} : vector<4x8x8xf32>, vector<4x8x8xf32>, vector<4x8x8xf32> -> vector<4x8x8xf32>
    "tpu.trace_stop"() : () -> ()
    %c0_10 = arith.constant 0 : index
    %c0_11 = arith.constant 0 : index
    %c0_12 = arith.constant 0 : index
    %46 = vector.load %arg4[%c0_10, %c0_11, %c0_12] : memref<4x8x32xf32, #tpu.memory_space<vmem>>, vector<4x8x32xf32>
    %47 = vector.extract_strided_slice %45 {offsets = [0, 0, 0], sizes = [1, 8, 8], strides = [1, 1, 1]} : vector<4x8x8xf32> to vector<1x8x8xf32>
    %48 = vector.shape_cast %47 : vector<1x8x8xf32> to vector<8x8xf32>
    %49 = vector.extract_strided_slice %46 {offsets = [0, 0, 0], sizes = [1, 8, 32], strides = [1, 1, 1]} : vector<4x8x32xf32> to vector<1x8x32xf32>
    %50 = vector.shape_cast %49 : vector<1x8x32xf32> to vector<8x32xf32>
    %cst_13 = arith.constant dense<0.000000e+00> : vector<8x32xf32>
    %51 = tpu.matmul %48, %50, %cst_13 {dimension_numbers = #tpu.dot_dimension_numbers<[1], [0], [0], [1], [0, 0, 1, 1], [], []>} : vector<8x8xf32>, vector<8x32xf32>, vector<8x32xf32> -> vector<8x32xf32>
    %52 = vector.extract_strided_slice %45 {offsets = [1, 0, 0], sizes = [1, 8, 8], strides = [1, 1, 1]} : vector<4x8x8xf32> to vector<1x8x8xf32>
    %53 = vector.shape_cast %52 : vector<1x8x8xf32> to vector<8x8xf32>
    %54 = vector.extract_strided_slice %46 {offsets = [1, 0, 0], sizes = [1, 8, 32], strides = [1, 1, 1]} : vector<4x8x32xf32> to vector<1x8x32xf32>
    %55 = vector.shape_cast %54 : vector<1x8x32xf32> to vector<8x32xf32>
    %cst_14 = arith.constant dense<0.000000e+00> : vector<8x32xf32>
    %56 = tpu.matmul %53, %55, %cst_14 {dimension_numbers = #tpu.dot_dimension_numbers<[1], [0], [0], [1], [0, 0, 1, 1], [], []>} : vector<8x8xf32>, vector<8x32xf32>, vector<8x32xf32> -> vector<8x32xf32>
    %57 = arith.addf %51, %56 : vector<8x32xf32>
    %58 = vector.extract_strided_slice %45 {offsets = [2, 0, 0], sizes = [1, 8, 8], strides = [1, 1, 1]} : vector<4x8x8xf32> to vector<1x8x8xf32>
    %59 = vector.shape_cast %58 : vector<1x8x8xf32> to vector<8x8xf32>
    %60 = vector.extract_strided_slice %46 {offsets = [2, 0, 0], sizes = [1, 8, 32], strides = [1, 1, 1]} : vector<4x8x32xf32> to vector<1x8x32xf32>
    %61 = vector.shape_cast %60 : vector<1x8x32xf32> to vector<8x32xf32>
    %cst_15 = arith.constant dense<0.000000e+00> : vector<8x32xf32>
    %62 = tpu.matmul %59, %61, %cst_15 {dimension_numbers = #tpu.dot_dimension_numbers<[1], [0], [0], [1], [0, 0, 1, 1], [], []>} : vector<8x8xf32>, vector<8x32xf32>, vector<8x32xf32> -> vector<8x32xf32>
    %63 = arith.addf %57, %62 : vector<8x32xf32>
    %64 = vector.extract_strided_slice %45 {offsets = [3, 0, 0], sizes = [1, 8, 8], strides = [1, 1, 1]} : vector<4x8x8xf32> to vector<1x8x8xf32>
    %65 = vector.shape_cast %64 : vector<1x8x8xf32> to vector<8x8xf32>
    %66 = vector.extract_strided_slice %46 {offsets = [3, 0, 0], sizes = [1, 8, 32], strides = [1, 1, 1]} : vector<4x8x32xf32> to vector<1x8x32xf32>
    %67 = vector.shape_cast %66 : vector<1x8x32xf32> to vector<8x32xf32>
    %cst_16 = arith.constant dense<0.000000e+00> : vector<8x32xf32>
    %68 = tpu.matmul %65, %67, %cst_16 {dimension_numbers = #tpu.dot_dimension_numbers<[1], [0], [0], [1], [0, 0, 1, 1], [], []>} : vector<8x8xf32>, vector<8x32xf32>, vector<8x32xf32> -> vector<8x32xf32>
    %69 = arith.addf %63, %68 : vector<8x32xf32>
    %c0_17 = arith.constant 0 : index
    %c0_18 = arith.constant 0 : index
    %70 = vector.load %arg8[%c0_17, %c0_18] : memref<6x32xf32, #tpu.memory_space<vmem>>, vector<1x32xf32>
    %71 = vector.broadcast %70 : vector<1x32xf32> to vector<8x32xf32>
    %72 = arith.addf %69, %71 : vector<8x32xf32>
    %73 = arith.addf %1, %72 : vector<8x32xf32>
    %c2 = arith.constant 2 : index
    %c0_19 = arith.constant 0 : index
    %74 = vector.load %arg8[%c2, %c0_19] : memref<6x32xf32, #tpu.memory_space<vmem>>, vector<1x32xf32>
    %c3 = arith.constant 3 : index
    %c0_20 = arith.constant 0 : index
    %75 = vector.load %arg8[%c3, %c0_20] : memref<6x32xf32, #tpu.memory_space<vmem>>, vector<1x32xf32>
    %cst_21 = arith.constant dense<0.000000e+00> : vector<8xf32>
    %76 = vector.multi_reduction <add>, %73, %cst_21 [1] : vector<8x32xf32> to vector<8xf32>
    %77 = vector.shape_cast %76 : vector<8xf32> to vector<8x1xf32>
    %cst_22 = arith.constant 3.200000e+01 : f32
    %78 = vector.broadcast %cst_22 : f32 to vector<8x1xf32>
    %79 = arith.divf %77, %78 : vector<8x1xf32>
    %80 = vector.broadcast %79 : vector<8x1xf32> to vector<8x32xf32>
    %81 = arith.subf %73, %80 : vector<8x32xf32>
    %82 = arith.mulf %81, %81 : vector<8x32xf32>
    %cst_23 = arith.constant dense<0.000000e+00> : vector<8xf32>
    %83 = vector.multi_reduction <add>, %82, %cst_23 [1] : vector<8x32xf32> to vector<8xf32>
    %84 = vector.shape_cast %83 : vector<8xf32> to vector<8x1xf32>
    %cst_24 = arith.constant 3.200000e+01 : f32
    %85 = vector.broadcast %cst_24 : f32 to vector<8x1xf32>
    %86 = arith.divf %84, %85 : vector<8x1xf32>
    %87 = vector.broadcast %79 : vector<8x1xf32> to vector<8x32xf32>
    %88 = arith.subf %73, %87 : vector<8x32xf32>
    %cst_25 = arith.constant 9.99999974E-6 : f32
    %89 = vector.broadcast %cst_25 : f32 to vector<8x1xf32>
    %90 = arith.addf %86, %89 : vector<8x1xf32>
    %91 = math.rsqrt %90 : vector<8x1xf32>
    %92 = vector.broadcast %91 : vector<8x1xf32> to vector<8x32xf32>
    %93 = arith.mulf %88, %92 : vector<8x32xf32>
    %94 = vector.broadcast %74 : vector<1x32xf32> to vector<8x32xf32>
    %95 = arith.mulf %93, %94 : vector<8x32xf32>
    %96 = vector.broadcast %75 : vector<1x32xf32> to vector<8x32xf32>
    %97 = arith.addf %95, %96 : vector<8x32xf32>
    %c0_26 = arith.constant 0 : index
    %c0_27 = arith.constant 0 : index
    %98 = vector.load %arg5[%c0_26, %c0_27] : memref<32x64xf32, #tpu.memory_space<vmem>>, vector<32x64xf32>
    %cst_28 = arith.constant dense<0.000000e+00> : vector<8x64xf32>
    %99 = tpu.matmul %97, %98, %cst_28 {dimension_numbers = #tpu.dot_dimension_numbers<[1], [0], [0], [1], [0, 0, 1, 1], [], []>} : vector<8x32xf32>, vector<32x64xf32>, vector<8x64xf32> -> vector<8x64xf32>
    %c0_29 = arith.constant 0 : index
    %c0_30 = arith.constant 0 : index
    %100 = vector.load %arg6[%c0_29, %c0_30] : memref<1x64xf32, #tpu.memory_space<vmem>>, vector<1x64xf32>
    %101 = vector.broadcast %100 : vector<1x64xf32> to vector<8x64xf32>
    %102 = arith.addf %99, %101 : vector<8x64xf32>
    %cst_31 = arith.constant 0.000000e+00 : f32
    %103 = vector.broadcast %cst_31 : f32 to vector<8x64xf32>
    %104 = arith.maximumf %102, %103 : vector<8x64xf32>
    %c0_32 = arith.constant 0 : index
    %c0_33 = arith.constant 0 : index
    %105 = vector.load %arg7[%c0_32, %c0_33] : memref<64x32xf32, #tpu.memory_space<vmem>>, vector<64x32xf32>
    %cst_34 = arith.constant dense<0.000000e+00> : vector<8x32xf32>
    %106 = tpu.matmul %104, %105, %cst_34 {dimension_numbers = #tpu.dot_dimension_numbers<[1], [0], [0], [1], [0, 0, 1, 1], [], []>} : vector<8x64xf32>, vector<64x32xf32>, vector<8x32xf32> -> vector<8x32xf32>
    %c1 = arith.constant 1 : index
    %c0_35 = arith.constant 0 : index
    %107 = vector.load %arg8[%c1, %c0_35] : memref<6x32xf32, #tpu.memory_space<vmem>>, vector<1x32xf32>
    %108 = vector.broadcast %107 : vector<1x32xf32> to vector<8x32xf32>
    %109 = arith.addf %106, %108 : vector<8x32xf32>
    %110 = arith.addf %1, %109 : vector<8x32xf32>
    %c4 = arith.constant 4 : index
    %c0_36 = arith.constant 0 : index
    %111 = vector.load %arg8[%c4, %c0_36] : memref<6x32xf32, #tpu.memory_space<vmem>>, vector<1x32xf32>
    %c5 = arith.constant 5 : index
    %c0_37 = arith.constant 0 : index
    %112 = vector.load %arg8[%c5, %c0_37] : memref<6x32xf32, #tpu.memory_space<vmem>>, vector<1x32xf32>
    %cst_38 = arith.constant dense<0.000000e+00> : vector<8xf32>
    %113 = vector.multi_reduction <add>, %110, %cst_38 [1] : vector<8x32xf32> to vector<8xf32>
    %114 = vector.shape_cast %113 : vector<8xf32> to vector<8x1xf32>
    %cst_39 = arith.constant 3.200000e+01 : f32
    %115 = vector.broadcast %cst_39 : f32 to vector<8x1xf32>
    %116 = arith.divf %114, %115 : vector<8x1xf32>
    %117 = vector.broadcast %116 : vector<8x1xf32> to vector<8x32xf32>
    %118 = arith.subf %110, %117 : vector<8x32xf32>
    %119 = arith.mulf %118, %118 : vector<8x32xf32>
    %cst_40 = arith.constant dense<0.000000e+00> : vector<8xf32>
    %120 = vector.multi_reduction <add>, %119, %cst_40 [1] : vector<8x32xf32> to vector<8xf32>
    %121 = vector.shape_cast %120 : vector<8xf32> to vector<8x1xf32>
    %cst_41 = arith.constant 3.200000e+01 : f32
    %122 = vector.broadcast %cst_41 : f32 to vector<8x1xf32>
    %123 = arith.divf %121, %122 : vector<8x1xf32>
    %124 = vector.broadcast %116 : vector<8x1xf32> to vector<8x32xf32>
    %125 = arith.subf %110, %124 : vector<8x32xf32>
    %cst_42 = arith.constant 9.99999974E-6 : f32
    %126 = vector.broadcast %cst_42 : f32 to vector<8x1xf32>
    %127 = arith.addf %123, %126 : vector<8x1xf32>
    %128 = math.rsqrt %127 : vector<8x1xf32>
    %129 = vector.broadcast %128 : vector<8x1xf32> to vector<8x32xf32>
    %130 = arith.mulf %125, %129 : vector<8x32xf32>
    %131 = vector.broadcast %111 : vector<1x32xf32> to vector<8x32xf32>
    %132 = arith.mulf %130, %131 : vector<8x32xf32>
    %133 = vector.broadcast %112 : vector<1x32xf32> to vector<8x32xf32>
    %134 = arith.addf %132, %133 : vector<8x32xf32>
    %135 = vector.shape_cast %134 : vector<8x32xf32> to vector<1x8x32xf32>
    %c0_43 = arith.constant 0 : index
    %c0_44 = arith.constant 0 : index
    %c0_45 = arith.constant 0 : index
    %136 = vector.load %arg9[%c0_43, %c0_44, %c0_45] : memref<1x8x32xf32, #tpu.memory_space<vmem>>, vector<1x8x32xf32>
    tpu.vector_store %arg9[%c0_43, %c0_44, %c0_45], %135 {strides = array<i32>} : memref<1x8x32xf32, #tpu.memory_space<vmem>>, vector<1x8x32xf32>,
    return
  }
  func.func @transform_0(%arg0: i32) -> (i32, i32, i32) {
    %c0_i32 = arith.constant 0 : i32
    %c0_i32_0 = arith.constant 0 : i32
    %c0_i32_1 = arith.constant 0 : i32
    return %arg0, %c0_i32, %c0_i32_0 : i32, i32, i32
  }
  func.func @transform_1(%arg0: i32) -> (i32, i32) {
    %c0_i32 = arith.constant 0 : i32
    %c0_i32_0 = arith.constant 0 : i32
    %c0_i32_1 = arith.constant 0 : i32
    return %c0_i32, %c0_i32_0 : i32, i32
  }
  func.func @transform_2(%arg0: i32) -> (i32, i32) {
    %c0_i32 = arith.constant 0 : i32
    %c0_i32_0 = arith.constant 0 : i32
    %c0_i32_1 = arith.constant 0 : i32
    return %c0_i32, %c0_i32_0 : i32, i32
  }
  func.func @transform_3(%arg0: i32) -> (i32, i32, i32) {
    %c0_i32 = arith.constant 0 : i32
    %c0_i32_0 = arith.constant 0 : i32
    %c0_i32_1 = arith.constant 0 : i32
    %c0_i32_2 = arith.constant 0 : i32
    return %c0_i32, %c0_i32_0, %c0_i32_1 : i32, i32, i32
  }
  func.func @transform_4(%arg0: i32) -> (i32, i32) {
    %c0_i32 = arith.constant 0 : i32
    %c0_i32_0 = arith.constant 0 : i32
    %c0_i32_1 = arith.constant 0 : i32
    return %c0_i32, %c0_i32_0 : i32, i32
  }
  func.func @transform_5(%arg0: i32) -> (i32, i32) {
    %c0_i32 = arith.constant 0 : i32
    %c0_i32_0 = arith.constant 0 : i32
    %c0_i32_1 = arith.constant 0 : i32
    return %c0_i32, %c0_i32_0 : i32, i32
  }
  func.func @transform_6(%arg0: i32) -> (i32, i32) {
    %c0_i32 = arith.constant 0 : i32
    %c0_i32_0 = arith.constant 0 : i32
    %c0_i32_1 = arith.constant 0 : i32
    return %c0_i32, %c0_i32_0 : i32, i32
  }
  func.func @transform_7(%arg0: i32) -> (i32, i32) {
    %c0_i32 = arith.constant 0 : i32
    %c0_i32_0 = arith.constant 0 : i32
    %c0_i32_1 = arith.constant 0 : i32
    return %c0_i32, %c0_i32_0 : i32, i32
  }
  func.func @transform_8(%arg0: i32) -> (i32, i32, i32) {
    %c0_i32 = arith.constant 0 : i32
    %c0_i32_0 = arith.constant 0 : i32
    %c0_i32_1 = arith.constant 0 : i32
    return %arg0, %c0_i32, %c0_i32_0 : i32, i32, i32
  }
}

</mosaic_0001>

<bundles_post_ra>
// kernel: transformer_lm_layer.1
= control target key start
LH: loop header
LB: loop body
LE: loop exit
PB: predicated region body
PF: predicated region fallthrough
CT: control target
= control target key end

     0   :  { %s3039_s0 = inlined_call_operand.hbm [shape: f32[2,8,32], index: 0, kind: input, shape index: {}]   ;;  %s3040_s1 = inlined_call_operand.hbm [shape: f32[32,96], index: 1, kind: input, shape index: {}]   ;;  %s3041_s2 = inlined_call_operand.hbm [shape: f32[1,96], index: 2, kind: input, shape index: {}]   ;;  %s3042_s3 = inlined_call_operand.hbm [shape: f32[4,8,32], index: 3, kind: input, shape index: {}]   ;;  %s3043_s4 = inlined_call_operand.hbm [shape: f32[32,64], index: 4, kind: input, shape index: {}]   ;;  %s3044_s5 = inlined_call_operand.hbm [shape: f32[1,64], index: 5, kind: input, shape index: {}]   ;;  %s3045_s6 = inlined_call_operand.hbm [shape: f32[64,32], index: 6, kind: input, shape index: {}]   ;;  %s3046_s7 = inlined_call_operand.hbm [shape: f32[6,32], index: 7, kind: input, shape index: {}]   ;;  %s3047_s8 = inlined_call_operand.hbm [shape: f32[2,8,32], index: 8, kind: output, shape index: {}]  }
   0x1   :  { %3053 = sst [smem:[#allocation23_spill]] %s3040_s1 }
   0x2   :  { %13 = vsyncpa [#allocation3], 0 }
   0x3   :  { %15 = vsyncpa [#allocation3 + $0x1], 0 }
   0x4   :  { %16 = vsyncpa [#allocation6], 0 }
   0x5   :  { %17 = vsyncpa [#allocation9], 0 }
   0x6   :  { %18 = vsyncpa [#allocation12], 0 }
   0x7   :  { %19 = vsyncpa [#allocation15], 0 }
   0x8   :  { %20 = vsyncpa [#allocation4], 0 }
   0x9   :  { %22 = vsyncpa [#allocation4 + $0x1], 0  ;;  %s2586_s27 = smov 0   ;;  %s2588_s28 = smov 0  }
   0xa   :  { %s2590_s29 = smov 0   ;;  %s2592_s30 = smov 0  }
   0xb LB: > { %s2522_s9 = smov [#allocation5]   ;;  %s2607_s11 = sadd.s32 4294967295, %s2520_s30   ;;  %s2520_s30 = sphi %s2592_s30, %s3079_s30   ;;  %s2516_s29 = sphi %s2590_s29, %s3078_s29   ;;  %s2512_s28 = sphi %s2588_s28, %s3077_s28   ;;  %s2508_s27 = sphi %s2586_s27, %s3076_s27  }
   0xc   : > { %s244_s10 = sshll.u32 %s2522_s9, 4  ;;  %p1845_p0 = scmp.ge.s32.totalorder %s2520_s30, 1  ;;  %s2612_s10 = int_to_ptr.vmem [resolvable:$true] %s244_s10 }
   0xd   : > { %p3050_p1 = scmp.eq.s32.totalorder %s2607_s11, 0  ;;  %p232_p2 = scmp.lt.s32.totalorder %s2520_s30, 3 }
   0xe   : > { %s2523_s13 = smov [#allocation8]   ;;  %s2524_s16 = smov [#allocation11]  }
   0xf   : > { %p2614_p3 = pnand %p1845_p0, %p232_p2  ;;  %s268_s14 = sshll.u32 %s2523_s13, 4  ;;  %s2627_s14 = int_to_ptr.vmem [resolvable:$true] %s268_s14 }
  0x10   : > { %s295_s17 = sshll.u32 %s2524_s16, 4  ;;  %s3056_s1 = sld [smem:[#allocation23_spill]]  ;;  %s2629_s17 = int_to_ptr.vmem [resolvable:$true] %s295_s17 }
  0x11   : > { %s3054_s12 = scalar_select %p2614_p3, 1, 0 }
  0x12   : > { %p2097_p5 = pneg %p2614_p3 }
  0x14   : > { %p2623_p6 = pnand %p2097_p5, %p3050_p1 }
  0x16   : > { %s2212_s20 = scalar_lea.hbm %s3056_s1, 512  ;;  %p2639_p8 = pneg %p2623_p6 }
  0x17   : > { %p2213_p7 = scmp.ne.s32.totalorder %s3056_s1, %s2212_s20  ;;  %p2219_p11 = scmp.lt.u32.totalorder %s2212_s20, %s3056_s1 }
  0x19   : > { %p2215_p9 = pnand %p2639_p8, %p2213_p7 }
  0x1b   : > { %p2216_p10 = pneg %p2215_p9 }
  0x1d   : > { %p2221_p12 = pnand %p2219_p11, %p2216_p10 }
  0x1f   : > { %2224 = shalt.err (!%p2221_p12)
}
  0x20   : > { %s2225_s26 = scalar_lea.vmem %s2612_s10, 512  ;;  %p2233_p5 = scmp.lt.s32.totalorder %s2612_s10, %s2612_s10 }
  0x21   : > { %p2226_p13 = scmp.ne.s32.totalorder %s2612_s10, %s2225_s26  ;;  %p2234_p4 = scmp.lt.s32.totalorder %s2225_s26, %s2225_s26 }
  0x23   : > { %p2228_p0 = pnand %p2226_p13, %p2639_p8  ;;  %p2235_p7 = por %p2234_p4, %p2233_p5 }
  0x25   : > { %p2229_p2 = pneg %p2228_p0 }
  0x27   : > { %p2236_p9 = pnand %p2235_p7, %p2229_p2 }
  0x29   : > { %2239 = shalt.err (!%p2236_p9)
}
  0x2a   : > { %s3048_s9 = smov 128   ;;  %s2526_s13 = smov 8  }
  0x2b   : > { %2100 = dma.hbm_to_vmem [thread:$0]  (!%p2623_p6), %s3056_s1, 512, %s2612_s10, [#allocation6], %s3048_s9, %s3048_s9, %s2526_s13  }
  0x2c   : > { %s2240_s21 = scalar_lea.hbm %s3042_s3, 512 }
  0x2d   : > { %p2241_p4 = scmp.ne.s32.totalorder %s3042_s3, %s2240_s21  ;;  %p2247_p12 = scmp.lt.u32.totalorder %s2240_s21, %s3042_s3 }
  0x2f   : > { %p2243_p10 = pnand %p2241_p4, %p2639_p8 }
  0x31   : > { %p2244_p11 = pneg %p2243_p10 }
  0x33   : > { %p2249_p13 = pnand %p2247_p12, %p2244_p11 }
  0x35   : > { %2252 = shalt.err (!%p2249_p13)
}
  0x36   : > { %s2253_s10 = scalar_lea.vmem %s2627_s14, 512  ;;  %p2261_p7 = scmp.lt.s32.totalorder %s2627_s14, %s2627_s14 }
  0x37   : > { %p2254_p0 = scmp.ne.s32.totalorder %s2627_s14, %s2253_s10  ;;  %p2262_p9 = scmp.lt.s32.totalorder %s2253_s10, %s2253_s10 }
  0x39   : > { %p2256_p2 = pnand %p2254_p0, %p2639_p8  ;;  %p2263_p4 = por %p2262_p9, %p2261_p7 }
  0x3b   : > { %p2257_p5 = pneg %p2256_p2 }
  0x3d   : > { %p2264_p10 = pnand %p2263_p4, %p2257_p5 }
  0x3f   : > { %2267 = shalt.err (!%p2264_p10)
}
  0x40   : > { %2106 = dma.hbm_to_vmem [thread:$0]  (!%p2623_p6), %s3042_s3, 512, %s2627_s14, [#allocation9], %s3048_s9, %s3048_s9, %s2526_s13  }
  0x41   : > { %s2268_s21 = scalar_lea.hbm %s3044_s5, 16 }
  0x42   : > { %p2269_p11 = scmp.ne.s32.totalorder %s3044_s5, %s2268_s21  ;;  %p2275_p0 = scmp.lt.u32.totalorder %s2268_s21, %s3044_s5 }
  0x44   : > { %p2271_p12 = pnand %p2269_p11, %p2639_p8 }
  0x46   : > { %p2272_p13 = pneg %p2271_p12 }
  0x48   : > { %p2277_p2 = pnand %p2275_p0, %p2272_p13 }
  0x4a   : > { %2280 = shalt.err (!%p2277_p2)
}
  0x4b   : > { %s2281_s14 = scalar_lea.vmem %s2629_s17, 16  ;;  %s2288_s10 = scalar_lea.vmem %s2629_s17, 32 }
  0x4c   : > { %p2282_p5 = scmp.ne.s32.totalorder %s2629_s17, %s2281_s14  ;;  %p2289_p4 = scmp.lt.s32.totalorder %s2629_s17, %s2629_s17 }
  0x4d   : > { %p2290_p10 = scmp.lt.s32.totalorder %s2288_s10, %s2281_s14 }
  0x4e   : > { %p2284_p7 = pnand %p2282_p5, %p2639_p8 }
  0x4f   : > { %p2291_p11 = por %p2290_p10, %p2289_p4 }
  0x50   : > { %p2285_p9 = pneg %p2284_p7 }
  0x52   : > { %p2292_p12 = pnand %p2291_p11, %p2285_p9 }
  0x54   : > { %2295 = shalt.err (!%p2292_p12)
}
  0x55   : > { %2112 = dma.hbm_to_vmem [thread:$0]  (!%p2623_p6), %s3044_s5, 16, %s2629_s17, [#allocation12]  }
  0x56   : > { %s2527_s19 = smov [#allocation7]   ;;  %s2528_s21 = smov [#allocation10]  }
  0x57   : > { %s258_s20 = sshll.u32 %s2527_s19, 4  ;;  %s281_s22 = sshll.u32 %s2528_s21, 4  ;;  %s259_s20 = int_to_ptr.vmem [resolvable:$true] %s258_s20  ;;  %s282_s22 = int_to_ptr.vmem [resolvable:$true] %s281_s22 }
  0x58   : > { %s2296_s26 = scalar_lea.hbm %s3041_s2, 16 }
  0x59   : > { %p2297_p13 = scmp.ne.s32.totalorder %s3041_s2, %s2296_s26  ;;  %p2303_p5 = scmp.lt.u32.totalorder %s2296_s26, %s3041_s2 }
  0x5b   : > { %p2299_p0 = pnand %p2297_p13, %p2639_p8 }
  0x5d   : > { %p2300_p2 = pneg %p2299_p0 }
  0x5f   : > { %p2305_p7 = pnand %p2303_p5, %p2300_p2 }
  0x61   : > { %2308 = shalt.err (!%p2305_p7)
}
  0x62   : > { %s2309_s17 = scalar_lea.vmem %s259_s20, 16  ;;  %s2316_s18 = scalar_lea.vmem %s259_s20, 32 }
  0x63   : > { %p2310_p9 = scmp.ne.s32.totalorder %s259_s20, %s2309_s17  ;;  %p2317_p11 = scmp.lt.s32.totalorder %s259_s20, %s259_s20 }
  0x64   : > { %p2318_p12 = scmp.lt.s32.totalorder %s2316_s18, %s2309_s17 }
  0x65   : > { %p2312_p4 = pnand %p2310_p9, %p2639_p8 }
  0x66   : > { %p2319_p1 = por %p2318_p12, %p2317_p11 }
  0x67   : > { %p2313_p10 = pneg %p2312_p4 }
  0x69   : > { %p2320_p3 = pnand %p2319_p1, %p2313_p10 }
  0x6b   : > { %2323 = shalt.err (!%p2320_p3)
}
  0x6c   : > { %2103 = dma.hbm_to_vmem [thread:$0]  (!%p2623_p6), %s3041_s2, 16, %s259_s20, [#allocation6]  }
  0x6d   : > { %s2324_s25 = scalar_lea.hbm %s3043_s4, 512 }
  0x6e   : > { %p2325_p13 = scmp.ne.s32.totalorder %s3043_s4, %s2324_s25  ;;  %p2331_p3 = scmp.lt.u32.totalorder %s2324_s25, %s3043_s4 }
  0x70   : > { %p2327_p0 = pnand %p2325_p13, %p2639_p8 }
  0x72   : > { %p2328_p1 = pneg %p2327_p0 }
  0x74   : > { %p2333_p2 = pnand %p2331_p3, %p2328_p1 }
  0x76   : > { %2336 = shalt.err (!%p2333_p2)
}
  0x77   : > { %s2337_s17 = scalar_lea.vmem %s282_s22, 512  ;;  %p2345_p4 = scmp.lt.s32.totalorder %s282_s22, %s282_s22 }
  0x78   : > { %p2338_p5 = scmp.ne.s32.totalorder %s282_s22, %s2337_s17  ;;  %p2346_p10 = scmp.lt.s32.totalorder %s2337_s17, %s2337_s17 }
  0x7a   : > { %p2340_p7 = pnand %p2338_p5, %p2639_p8  ;;  %p2347_p11 = por %p2346_p10, %p2345_p4 }
  0x7c   : > { %p2341_p9 = pneg %p2340_p7 }
  0x7e   : > { %p2348_p12 = pnand %p2347_p11, %p2341_p9 }
  0x80   : > { %2351 = shalt.err (!%p2348_p12)
}
  0x81   : > { %s3058_s20 = smov 128   ;;  %s2529_s21 = smov [#allocation13]  }
  0x82   : > { %2109 = dma.hbm_to_vmem [thread:$0]  (!%p2623_p6), %s3043_s4, 512, %s282_s22, [#allocation9], %s3058_s20, %s3058_s20, %s2526_s13  }
  0x83   : > { %s305_s9 = sshll.u32 %s2529_s21, 4  ;;  %s2530_s24 = smov [#allocation14]   ;;  %s306_s9 = int_to_ptr.vmem [resolvable:$true] %s305_s9 }
  0x84   : > { %s319_s25 = sshll.u32 %s2530_s24, 4  ;;  %s2352_s10 = scalar_lea.hbm %s3045_s6, 1024  ;;  %s320_s25 = int_to_ptr.vmem [resolvable:$true] %s319_s25 }
  0x85   : > { %p2353_p13 = scmp.ne.s32.totalorder %s3045_s6, %s2352_s10  ;;  %p2359_p3 = scmp.lt.u32.totalorder %s2352_s10, %s3045_s6 }
  0x87   : > { %p2355_p0 = pnand %p2353_p13, %p2639_p8 }
  0x89   : > { %p2356_p1 = pneg %p2355_p0 }
  0x8b   : > { %p2361_p2 = pnand %p2359_p3, %p2356_p1 }
  0x8d   : > { %2364 = shalt.err (!%p2361_p2)
}
  0x8e   : > { %s2365_s22 = scalar_lea.vmem %s306_s9, 1024  ;;  %p2373_p4 = scmp.lt.s32.totalorder %s306_s9, %s306_s9 }
  0x8f   : > { %p2366_p5 = scmp.ne.s32.totalorder %s306_s9, %s2365_s22  ;;  %p2374_p10 = scmp.lt.s32.totalorder %s2365_s22, %s2365_s22 }
  0x91   : > { %p2368_p7 = pnand %p2366_p5, %p2639_p8  ;;  %p2375_p11 = por %p2374_p10, %p2373_p4 }
  0x93   : > { %p2369_p9 = pneg %p2368_p7 }
  0x95   : > { %p2376_p12 = pnand %p2375_p11, %p2369_p9 }
  0x97   : > { %2379 = shalt.err (!%p2376_p12)
}
  0x98   : > { %2115 = dma.hbm_to_vmem [thread:$0]  (!%p2623_p6), %s3045_s6, 1024, %s306_s9, [#allocation12], %s3058_s20, %s3058_s20, %s2526_s13  }
  0x99   : > { %s2380_s26 = scalar_lea.hbm %s3046_s7, 128 }
  0x9a   : > { %p2381_p13 = scmp.ne.s32.totalorder %s3046_s7, %s2380_s26  ;;  %p2387_p3 = scmp.lt.u32.totalorder %s2380_s26, %s3046_s7 }
  0x9c   : > { %p2383_p0 = pnand %p2381_p13, %p2639_p8 }
  0x9e   : > { %p2384_p1 = pneg %p2383_p0 }
  0xa0   : > { %p2389_p2 = pnand %p2387_p3, %p2384_p1 }
  0xa2   : > { %2392 = shalt.err (!%p2389_p2)
}
  0xa3   : > { %s2393_s18 = scalar_lea.vmem %s320_s25, 128  ;;  %p2401_p4 = scmp.lt.s32.totalorder %s320_s25, %s320_s25 }
  0xa4   : > { %p2394_p5 = scmp.ne.s32.totalorder %s320_s25, %s2393_s18  ;;  %p2402_p10 = scmp.lt.s32.totalorder %s2393_s18, %s2393_s18 }
  0xa6   : > { %p2396_p7 = pnand %p2394_p5, %p2639_p8  ;;  %p2403_p11 = por %p2402_p10, %p2401_p4 }
  0xa8   : > { %p2397_p9 = pneg %p2396_p7 }
  0xaa   : > { %p2404_p12 = pnand %p2403_p11, %p2397_p9 }
  0xac   : > { %2407 = shalt.err (!%p2404_p12)
}
  0xad   : > { %2118 = dma.hbm_to_vmem [thread:$0]  (!%p2623_p6), %s3046_s7, 128, %s320_s25, [#allocation15]  }
  0xae   : > { %s1844_s23 = sadd.s32 4294967294, %s2520_s30   ;;  %s2793_s15 = sadd.s32 1, %s2520_s30  }
  0xaf   : > { %s35_s9 = sadd.s32 1, %s2516_s29  ;;  %s32_s22 = ssub.s32 %s2520_s30, %s2793_s15 }
  0xb0   : > { %p42_p8 = scmp.ne.s32.totalorder %s2516_s29, %s2512_s28  ;;  %p33_p13 = scmp.eq.s32.totalorder %s32_s22, 0 }
  0xb1   : > { %p43_p0 = scmp.eq.s32.totalorder %s2520_s30, 0  ;;  %p48_p1 = scmp.ne.s32.totalorder %s2512_s28, %s2508_s27 }
  0xb2   : > { %p219_p3 = scmp.eq.s32.totalorder %s2607_s11, 1  ;;  %p3059_p5 = scmp.eq.s32.totalorder %s2607_s11, 0 }
  0xb3   : > { %s2805_s1 = scalar_select %p33_p13, %s2516_s29, %s35_s9  }
  0xb4   : > { %p44_p2 = por %p43_p0, %p42_p8  ;;  %p2809_p7 = por %p3059_p5, %p48_p1 }
  0xb5   : > { %p2813_p6 = por %p219_p3, %p42_p8  ;;  %p225_p9 = scmp.eq.s32.totalorder %s1844_s23, 1 }
  0xb6   : > { %p2134_p4 = scmp.lt.s32.totalorder %s2520_s30, 2  ;;  %s330_s21 = sand.u32 1, %s2516_s29  }
  0xb7   : > { %s3061_s25 = scalar_select %p2813_p6, 1, 0 }
  0xb8   : > { %p2819_p10 = por %p225_p9, %p48_p1  ;;  %s1854_s26 = sshll.u32 %s330_s21, 3 }
  0xb9   : > { %s1855_s14 = sshll.u32 %s2520_s30, 7  ;;  %s334_s18 = scalar_lea.vmem [#allocation2], %s1854_s26 }
  0xba   : > { %s3062_s24 = scalar_select %p2819_p10, 1, 0 }
  0xbb   : > { %s2827_s17 = scalar_lea.hbm %s3039_s0, %s1855_s14  ;;  %s341_s13 = sshll.u32 %s334_s18, 4  ;;  %s2833_s13 = int_to_ptr.vmem [resolvable:$true] %s341_s13 }
  0xbc   : > { %p2829_p11 = pnand %p2134_p4, %p44_p2  ;;  %s331_s23 = scalar_lea.sflag [#allocation3], %s330_s21 }
  0xbd   : > { %s2408_s9 = scalar_lea.hbm %s2827_s17, 128  ;;  %s2413_s14 = scalar_lea.hbm %s3039_s0, 256 }
  0xbe   : > { %p2409_p12 = scmp.ne.s32.totalorder %s2827_s17, %s2408_s9  ;;  %p2410_p8 = pneg %p2829_p11 }
  0xbf   : > { %p2414_p1 = scmp.lt.u32.totalorder %s2827_s17, %s3039_s0  ;;  %p2415_p3 = scmp.lt.u32.totalorder %s2413_s14, %s2408_s9 }
  0xc0   : > { %p2411_p13 = pnand %p2410_p8, %p2409_p12  ;;  %p2417_p5 = scmp.lt.u32.totalorder %s2408_s9, %s2827_s17 }
  0xc1   : > { %p2416_p2 = por %p2415_p3, %p2414_p1 }
  0xc2   : > { %p2412_p0 = pneg %p2411_p13 }
  0xc3   : > { %p2418_p9 = por %p2417_p5, %p2416_p2 }
  0xc5   : > { %p2419_p4 = pnand %p2418_p9, %p2412_p0 }
  0xc7   : > { %2422 = shalt.err (!%p2419_p4)
}
  0xc8   : > { %s2423_s21 = scalar_lea.vmem %s2833_s13, 128  ;;  %s2531_s18 = smov [#allocation2]  }
  0xc9   : > { %p2424_p12 = scmp.ne.s32.totalorder %s2833_s13, %s2423_s21  ;;  %s2428_s22 = sshll.u32 %s2531_s18, 4  ;;  %s2429_s22 = int_to_ptr.vmem [resolvable:$false] %s2428_s22 }
  0xca   : > { %s2430_s26 = scalar_lea.vmem %s2429_s22, 256  ;;  %p2431_p6 = scmp.lt.s32.totalorder %s2833_s13, %s2429_s22 }
  0xcb   : > { %p2426_p13 = pnand %p2424_p12, %p2410_p8  ;;  %p2432_p1 = scmp.lt.s32.totalorder %s2430_s26, %s2423_s21 }
  0xcd   : > { %p2427_p10 = pneg %p2426_p13  ;;  %p2433_p3 = por %p2432_p1, %p2431_p6 }
  0xcf   : > { %p2434_p2 = pnand %p2433_p3, %p2427_p10 }
  0xd1   : > { %2437 = shalt.err (!%p2434_p2)
}
  0xd2   : > { %2122 = dma.hbm_to_vmem [thread:$0]  (!%p2829_p11), %s2827_s17, 128, %s2833_s13, %s331_s23  }
  0xd3   : > { %p3064_p0 = scmp.ne.s32.totalorder %s3054_s12, 0 }
  0xd4   : > { %s2863_s9 = sand.u32 (!%p3064_p0), 1, %s2512_s28  }
  0xd5   : > { %350 = sbr.rel (%p3064_p0) target bundleno = 2725 (0xaa5), region = 52  ;;  %s1857_s14 = sshll.u32 (!%p3064_p0), %s2863_s9, 3 }
  0xd6   : > { %s353_s10 = scalar_lea.sflag (!%p3064_p0), [#allocation3], %s2863_s9  ;;  %s356_s16 = scalar_lea.vmem (!%p3064_p0), [#allocation2], %s1857_s14 }
  0xdc   : > { %2483 = dma.done.wait (%p2809_p7), %s353_s10, 128  }
  0xdd   : > { %2485 = vsyncadd (%p2809_p7), %s353_s10, 4294967168  ;;  %p3065_p6 = scmp.eq.s32.totalorder %s2607_s11, 0 }
  0xdf   : > { %2487 = dma.done.wait (%p3065_p6), [#allocation6], 528   ;;  %p3066_p10 = pmov %p3065_p6 }
  0xe0   : > { %p3067_p11 = pmov %p3065_p6 }
  0xe1   : > { %2489 = vsyncadd (%p3066_p10), [#allocation6], 4294966768 }
  0xe2   : > { %2491 = dma.done.wait (%p3067_p11), [#allocation9], 1024   ;;  %p3068_p8 = pmov %p3065_p6 }
  0xe3   : > { %p3069_p5 = pmov %p3065_p6 }
  0xe4   : > { %2493 = vsyncadd (%p3068_p8), [#allocation9], 4294966272 }
  0xe5   : > { %2495 = dma.done.wait (%p3069_p5), [#allocation12], 1040   ;;  %p3070_p9 = pmov %p3069_p5 }
  0xe6   : > { %p3071_p7 = pmov %p3069_p5 }
  0xe7   : > { %2497 = vsyncadd (%p3070_p9), [#allocation12], 4294966256 }
  0xe8   : > { %2499 = dma.done.wait (%p3071_p7), [#allocation15], 128   ;;  %p3072_p4 = pmov %p3069_p5 }
  0xe9   : > { %v2532_v0 = vmov 0.0|0.0   ;;  %vm2533_vm0 = vmmov 0   ;;  %v2534_v1 = vmov 0.0   ;;  %v418_v2 = vld [vmem:[#allocation5] sm:$0xff]  ;;  %v419_v3 = vld [vmem:[#allocation5 + $0x8] sm:$0xff]  ;;  %v420_v4 = vld [vmem:[#allocation5 + $0x10] sm:$0xff] }
  0xea   : > { %2501 = vsyncadd (%p3072_p4), [#allocation15], 4294967168  ;;  %2041 = vmatprep.subr.bf16.mxu0 %v2532_v0  ;;  %1948 = vmatprep.mubr.msk.f32.mxu0 %vm2533_vm0, %v2534_v1  ;;  %v2042_v5 = vpack.c.bf16 %v419_v3, %v418_v2  ;;  %v421_v6 = vld [vmem:[#allocation5 + $0x18] sm:$0xff]  ;;  %vm429_vm1 = vcmask 261120   ;;  %v1866_v9 = vld [vmem:[#allocation7] ss:$0 sm:$0xff] }
  0xeb   : > { %1956 = vmatprep.subr.mxu1 %v2534_v1  ;;  %1958 = vmatprep.mubr.msk.f32.mxu1 %vm2533_vm0, %v2534_v1  ;;  %v2045_v7 = vpack.c.bf16 %v421_v6, %v420_v4  ;;  %v2896_v8 = vld [vmem:[%s356_s16] sm:$0xff]  ;;  %s2535_s12 = smov 104   ;;  %s2536_s19 = smov 120   ;;  %vm512_vm2 = vcmask 64512   ;;  %vm1592_vm3 = vcmask 523264  }
  0xec   : > { %2043 = vmatpush3.bf16.msra.mxu0 %v2042_v5  ;;  %s2537_s17 = smov 96   ;;  %s2538_s13 = smov 112   ;;  %v1163_v5 = vld [vmem:[#allocation8] sm:$0xff] }
  0xed   : > { %2044 = vmatprep.subr.bf16.mxu0 %v2532_v0  ;;  %s2539_s20 = smov 64   ;;  %s1894_s23 = sshll.u32 %s2607_s11, 7 }
  0xee   : > { %s416_s21 = scalar_lea.vmem [#allocation16], %s1857_s14  ;;  %s2994_s10 = scalar_lea.hbm %s3047_s8, %s1894_s23 }
  0xef   : > { %s1707_s18 = sshll.u32 %s416_s21, 4  ;;  %s1694_s16 = scalar_lea.sflag [#allocation4], %s2863_s9  ;;  %s2996_s18 = int_to_ptr.vmem [resolvable:$true] %s1707_s18 }
  0xf0   : > { %2046 = vmatpush3.bf16.msra.mxu0 %v2045_v7  ;;  %v1164_v7 = vld [vmem:[#allocation8 + $0x8] sm:$0xff]  ;;  %p3073_p13 = scmp.ne.s32.totalorder %s3061_s25, 0  ;;  %s2540_s11 = smov [#allocation16]  }
  0xf1   : > { %1951 = vmatprep.subr.mxu0 %v2534_v1  ;;  %s2442_s14 = sshll.u32 %s2540_s11, 4  ;;  %s2443_s14 = int_to_ptr.vmem [resolvable:$false] %s2442_s14 }
  0xf2   : > { %p2445_p2 = scmp.lt.s32.totalorder %s2996_s18, %s2443_s14 }
  0xf3   : > { %1949 = vmatmul.mubr.msk.f32.vlgmr.msra.gmra.mrb[0].mxu0 %vm429_vm1, %v2896_v8 }
  0xf4   : > { %1953 = vmatprep.mubr.msk.f32.mxu0 %vm2533_vm0, %v2534_v1 }
 0x1c6   : > { %v499_v10 = vpop.f32.mrb[0].mxu0 }
 0x1c7   : > { %v500_v11 = vadd.f32 %v1866_v9, %v499_v10  ;;  %v1950_v12 = vpop.f32.mrb[1].mxu0  ;;  %v1166_v9 = vld [vmem:[#allocation8 + $0x18] sm:$0xff] }
 0x1c8   : > { %v1165_v12 = vld [vmem:[#allocation8 + $0x10] sm:$0xff] }
 0x1c9   : > { %508 = vrot.lane.b32.xlu1 %v500_v11, %s2535_s12  ;;  %504 = vrot.lane.b32.xlu0 %v500_v11, %s2536_s19  ;;  %s2438_s12 = scalar_lea.vmem %s2996_s18, 128  ;;  %s2444_s19 = scalar_lea.vmem %s2443_s14, 256 }
 0x1ca   : > { %p2439_p12 = scmp.ne.s32.totalorder %s2996_s18, %s2438_s12  ;;  %p2446_p0 = scmp.lt.s32.totalorder %s2444_s19, %s2438_s12 }
 0x1cc   : > { %p2440_p1 = pnand %p2439_p12, %p3073_p13  ;;  %p2447_p6 = por %p2446_p0, %p2445_p2 }
 0x1cd   : > { %510 = vrot.lane.b32.xlu1 %v500_v11, %s2537_s17  ;;  %506 = vrot.lane.b32.xlu0 %v500_v11, %s2538_s13 }
 0x1ce   : > { %p2441_p3 = pneg %p2440_p1 }
 0x1d0   : > { %p2448_p10 = pnand %p2447_p6, %p2441_p3 }
 0x23b   : > { %v2903_v13 = vpop.permute.xlu1 %508  ;;  %v505_v14 = vpop.permute.xlu0 %504 }
 0x23c   : > { %587 = vrot.lane.b32.xlu0 %v505_v14, %s2537_s17 }
 0x23f   : > { %v511_v15 = vpop.permute.xlu1 %510  ;;  %v2905_v16 = vpop.permute.xlu0 %506 }
 0x240   : > { %1952 = vmatpush3.xpose.msk.msra.mxu0 %vm512_vm2, %v511_v15  ;;  %739 = vrot.lane.b32.xlu0 %v2903_v13, %s2537_s17 }
 0x241   : > { %663 = vrot.lane.b32.xlu1 %v2905_v16, %s2537_s17  ;;  %1961 = vmatprep.subr.mxu0 %v2534_v1 }
 0x243   : > { %1954 = vmatmul.mubr.msk.f32.vlgmr.msra.gmra.mrb[2].mxu0 %vm512_vm2, %v500_v11 }
 0x244   : > { %1963 = vmatprep.mubr.msk.f32.mxu0 %vm2533_vm0, %v2534_v1 }
 0x2ae   : > { %v588_v17 = vpop.permute.xlu0 %587 }
 0x2af   : > { %1957 = vmatpush3.xpose.msk.msra.mxu1 %vm512_vm2, %v588_v17 }
 0x2b0   : > { %1966 = vmatprep.subr.mxu1 %v2534_v1 }
 0x2b2   : > { %1959 = vmatmul.mubr.msk.f32.vlgmr.msra.gmra.mrb[0].mxu1 %vm512_vm2, %v505_v14  ;;  %v740_v18 = vpop.permute.xlu0 %739 }
 0x2b3   : > { %v664_v19 = vpop.permute.xlu1 %663  ;;  %1967 = vmatpush3.xpose.msk.msra.mxu1 %vm512_vm2, %v740_v18  ;;  %1968 = vmatprep.mubr.msk.f32.mxu1 %vm2533_vm0, %v2534_v1 }
 0x2b4   : > { %1962 = vmatpush3.xpose.msk.msra.mxu0 %vm512_vm2, %v664_v19  ;;  %1976 = vmatprep.subr.mxu1 %v2534_v1 }
 0x2b5   : > { %1971 = vmatprep.subr.mxu0 %v2534_v1 }
 0x2b6   : > { %1969 = vmatmul.mubr.msk.f32.vlgmr.msra.gmra.mrb[2].mxu1 %vm512_vm2, %v2903_v13 }
 0x2b7   : > { %1964 = vmatmul.mubr.msk.f32.vlgmr.msra.gmra.mrb[4].mxu0 %vm512_vm2, %v2905_v16  ;;  %1978 = vmatprep.mubr.msk.f32.mxu1 %vm2533_vm0, %v2534_v1 }
 0x2b8   : > { %1973 = vmatprep.mubr.msk.f32.mxu0 %vm2533_vm0, %v2534_v1 }
 0x316   : > { %v583_v20 = vpop.f32.mrb[2].mxu0 }
 0x317   : > { %v1955_v21 = vpop.f32.mrb[3].mxu0  ;;  %v815_v22 = vsel %vm512_vm2, %v583_v20, -inf }
 0x318   : > { %816 = vmax.xlane.f32.xlu1 %v815_v22 }
 0x385   : > { %v659_v23 = vpop.f32.mrb[0].mxu1 }
 0x386   : > { %v1960_v24 = vpop.f32.mrb[1].mxu1  ;;  %v818_v25 = vsel %vm512_vm2, %v659_v23, -inf }
 0x387   : > { %819 = vmax.xlane.f32.xlu0 %v818_v25 }
 0x389   : > { %v811_v26 = vpop.f32.mrb[2].mxu1 }
 0x38a   : > { %v735_v27 = vpop.f32.mrb[4].mxu0  ;;  %v1970_v28 = vpop.f32.mrb[3].mxu1  ;;  %v824_v29 = vsel %vm512_vm2, %v811_v26, -inf }
 0x38b   : > { %v1965_v30 = vpop.f32.mrb[5].mxu0  ;;  %825 = vmax.xlane.f32.xlu1 %v824_v29  ;;  %v821_v31 = vsel %vm512_vm2, %v735_v27, -inf  ;;  %v1884_v29 = vld [vmem:[#allocation14] ss:$0 sm:$0xff] }
 0x38c   : > { %822 = vmax.xlane.f32.xlu0 %v821_v31 }
 0x39c   : > { %935 = vrot.lane.b32.xlu1 %v505_v14, %s2539_s20 }
 0x3a2   : > { %859 = vrot.lane.b32.xlu0 %v500_v11, %s2539_s20 }
 0x3a5   : > { %v817_v32 = vpop.xlane.xlu1 %816 }
 0x3a6   : > { %v827_v33 = vsub.f32 %v583_v20, %v817_v32 }
 0x3a8   : > { %v831_v34 = vmul.f32 1.442695, %v827_v33 }
 0x3aa   : > { %2192 = vpow2.f32 %v831_v34 }
 0x3b4   : > { %v2193_v35 = vpop.eup %2192 }
 0x3b5   : > { %v839_v36 = vsel %vm512_vm2, %v2193_v35, 0.0 }
 0x3c1   : > { %840 = vadd.xlane.f32.xlu0 %v839_v36 }
 0x414   : > { %v820_v37 = vpop.xlane.xlu0 %819 }
 0x415   : > { %v828_v38 = vsub.f32 %v659_v23, %v820_v37 }
 0x417   : > { %v833_v39 = vmul.f32 1.442695, %v828_v38  ;;  %v1494_v38 = vld [vmem:[#allocation10] sm:$0xff] }
 0x418   : > { %v826_v40 = vpop.xlane.xlu1 %825 }
 0x419   : > { %2194 = vpow2.f32 %v833_v39  ;;  %v830_v41 = vsub.f32 %v811_v26, %v826_v40  ;;  %v823_v42 = vpop.xlane.xlu0 %822  ;;  %v1495_v39 = vld [vmem:[#allocation10 + $0x8] sm:$0xff] }
 0x41a   : > { %v829_v43 = vsub.f32 %v735_v27, %v823_v42  ;;  %v2048_v40 = vpack.c.bf16 %v1495_v39, %v1494_v38  ;;  %v1497_v42 = vld [vmem:[#allocation10 + $0x18] sm:$0xff] }
 0x41b   : > { %v837_v44 = vmul.f32 1.442695, %v830_v41  ;;  %v1496_v41 = vld [vmem:[#allocation10 + $0x10] sm:$0xff] }
 0x41c   : > { %v835_v45 = vmul.f32 1.442695, %v829_v43  ;;  %v936_v46 = vpop.permute.xlu1 %935  ;;  %v2051_v43 = vpack.c.bf16 %v1497_v42, %v1496_v41 }
 0x41d   : > { %2196 = vpow2.f32 %v837_v44  ;;  %v860_v47 = vpop.permute.xlu0 %859  ;;  %1977 = vmatpush3.msra.mxu1 %v936_v46  ;;  %v1579_v44 = vld [vmem:[#allocation13] sm:$0xff]  ;;  %v1581_v46 = vld [vmem:[#allocation13 + $0x10] sm:$0xff] }
 0x41e   : > { %2198 = vpow2.f32 %v835_v45  ;;  %1972 = vmatpush3.msra.mxu0 %v860_v47  ;;  %1986 = vmatprep.subr.mxu1 %v2534_v1  ;;  %v1580_v45 = vld [vmem:[#allocation13 + $0x8] sm:$0xff] }
 0x41f   : > { %1981 = vmatprep.subr.mxu0 %v2534_v1  ;;  %v2054_v47 = vpack.c.bf16 %v1580_v45, %v1579_v44 }
 0x423   : > { %v2195_v48 = vpop.eup %2194 }
 0x424   : > { %v842_v49 = vsel %vm512_vm2, %v2195_v48, 0.0 }
 0x425   : > { %843 = vadd.xlane.f32.xlu1 %v842_v49 }
 0x427   : > { %v2197_v50 = vpop.eup %2196 }
 0x428   : > { %v2199_v51 = vpop.eup %2198  ;;  %v848_v52 = vsel %vm512_vm2, %v2197_v50, 0.0 }
 0x429   : > { %849 = vadd.xlane.f32.xlu1 %v848_v52  ;;  %v845_v53 = vsel %vm512_vm2, %v2199_v51, 0.0 }
 0x42a   : > { %846 = vadd.xlane.f32.xlu0 %v845_v53 }
 0x43a   : > { %1011 = vrot.lane.b32.xlu1 %v2905_v16, %s2539_s20 }
 0x440   : > { %1087 = vrot.lane.b32.xlu0 %v2903_v13, %s2539_s20 }
 0x44e   : > { %v841_v54 = vpop.xlane.xlu0 %840 }
 0x44f   : > { %2200 = vrcp.f32 %v841_v54 }
 0x459   : > { %v2201_v55 = vpop.eup %2200 }
 0x45a   : > { %v855_v56 = vmul.f32 %v2201_v55, %v2193_v35 }
 0x45c   : > { %1974 = vmatmul.mubr.msk.f32.vlgmr.msra.gmra.mrb[6].mxu0 %vm512_vm2, %v855_v56 }
 0x45d   : > { %1983 = vmatprep.mubr.msk.f32.mxu0 %vm2533_vm0, %v2534_v1 }
 0x4b2   : > { %v844_v57 = vpop.xlane.xlu1 %843 }
 0x4b3   : > { %2202 = vrcp.f32 %v844_v57  ;;  %v1885_v57 = vld [vmem:[#allocation14 + $0x2] ss:$0 sm:$0xff] }
 0x4b6   : > { %v850_v58 = vpop.xlane.xlu1 %849 }
 0x4b7   : > { %2204 = vrcp.f32 %v850_v58  ;;  %v847_v59 = vpop.xlane.xlu0 %846 }
 0x4b8   : > { %2206 = vrcp.f32 %v847_v59  ;;  %v1886_v59 = vld [vmem:[#allocation14 + $0x3] ss:$0 sm:$0xff] }
 0x4ba   : > { %v1012_v60 = vpop.permute.xlu1 %1011 }
 0x4bb   : > { %1982 = vmatpush3.msra.mxu0 %v1012_v60  ;;  %v1088_v63 = vpop.permute.xlu0 %1087 }
 0x4bc   : > { %1991 = vmatprep.subr.mxu0 %v2534_v1 }
 0x4bd   : > { %v2203_v61 = vpop.eup %2202 }
 0x4be   : > { %v856_v62 = vmul.f32 %v2203_v61, %v2195_v48  ;;  %v1582_v48 = vld [vmem:[#allocation13 + $0x18] sm:$0xff] }
 0x4bf   : > { %v2057_v49 = vpack.c.bf16 %v1582_v48, %v1581_v46 }
 0x4c0   : > { %1979 = vmatmul.mubr.msk.f32.vlgmr.msra.gmra.mrb[4].mxu1 %vm512_vm2, %v856_v62  ;;  %v1585_v62 = vld [vmem:[#allocation13 + $0x30] sm:$0xff] }
 0x4c1   : > { %v2205_v2 = vpop.eup %2204  ;;  %1987 = vmatpush3.msra.mxu1 %v1088_v63  ;;  %1988 = vmatprep.mubr.msk.f32.mxu1 %vm2533_vm0, %v2534_v1  ;;  %v1586_v63 = vld [vmem:[#allocation13 + $0x38] sm:$0xff] }
 0x4c2   : > { %v2207_v3 = vpop.eup %2206  ;;  %v858_v4 = vmul.f32 %v2205_v2, %v2197_v50  ;;  %1996 = vmatprep.subr.mxu1 %v2534_v1  ;;  %v1583_v50 = vld [vmem:[#allocation13 + $0x20] sm:$0xff]  ;;  %v2063_v2 = vpack.c.bf16 %v1586_v63, %v1585_v62 }
 0x4c3   : > { %v857_v6 = vmul.f32 %v2207_v3, %v2199_v51  ;;  %v1584_v51 = vld [vmem:[#allocation13 + $0x28] sm:$0xff]  ;;  %v1887_v3 = vld [vmem:[#allocation11] ss:$0 sm:$0xff] }
 0x4c4   : > { %1989 = vmatmul.mubr.msk.f32.vlgmr.msra.gmra.mrb[6].mxu1 %vm512_vm2, %v858_v4  ;;  %v2060_v52 = vpack.c.bf16 %v1584_v51, %v1583_v50 }
 0x4c5   : > { %1984 = vmatmul.mubr.msk.f32.vlgmr.msra.gmra.mrb[8].mxu0 %vm512_vm2, %v857_v6  ;;  %1997 = vmatpush3.msra.mxu1 %v1163_v5 }
 0x4c6   : > { %1998 = vmatprep.mubr.msk.f32.mxu1 %vm2533_vm0, %v2534_v1  ;;  %1992 = vmatpush3.msra.mxu0 %v1164_v7  ;;  %v1889_v7 = vld [vmem:[#allocation14 + $0x1] ss:$0 sm:$0xff] }
 0x4c7   : > { %1993 = vmatprep.mubr.msk.f32.mxu0 %vm2533_vm0, %v2534_v1  ;;  %2001 = vmatprep.subr.mxu0 %v2534_v1 }
 0x4c8   : > { %2006 = vmatprep.subr.mxu1 %v2534_v1 }
 0x52f   : > { %v931_v10 = vpop.f32.mrb[6].mxu0 }
 0x530   : > { %v1975_v11 = vpop.f32.mrb[7].mxu0  ;;  %1999 = vmatmul.mubr.msk.f32.vlgmr.msra.gmra.mrb[8].mxu1 %vm512_vm2, %v931_v10 }
 0x531   : > { %2007 = vmatpush3.msra.mxu1 %v1166_v9  ;;  %2008 = vmatprep.mubr.msk.f32.mxu1 %vm2533_vm0, %v2534_v1 }
 0x532   : > { %2053 = vmatprep.subr.bf16.mxu1 %v2532_v0 }
 0x593   : > { %v1007_v13 = vpop.f32.mrb[4].mxu1 }
 0x594   : > { %v1980_v14 = vpop.f32.mrb[5].mxu1  ;;  %1994 = vmatmul.mubr.msk.f32.vlgmr.msra.gmra.mrb[10].mxu0 %vm512_vm2, %v1007_v13 }
 0x595   : > { %2002 = vmatpush3.msra.mxu0 %v1165_v12  ;;  %2003 = vmatprep.mubr.msk.f32.mxu0 %vm2533_vm0, %v2534_v1 }
 0x596   : > { %2047 = vmatprep.subr.bf16.mxu0 %v2532_v0 }
 0x597   : > { %v1159_v15 = vpop.f32.mrb[6].mxu1 }
 0x598   : > { %v1083_v16 = vpop.f32.mrb[8].mxu0  ;;  %v1990_v17 = vpop.f32.mrb[7].mxu1  ;;  %2009 = vmatmul.mubr.msk.f32.vlgmr.msra.gmra.mrb[10].mxu1 %vm512_vm2, %v1159_v15 }
 0x599   : > { %v1985_v18 = vpop.f32.mrb[9].mxu0  ;;  %2004 = vmatmul.mubr.msk.f32.vlgmr.msra.gmra.mrb[12].mxu0 %vm512_vm2, %v1083_v16  ;;  %2038 = vmatprep.mubr.msk.f32.mxu1 %vm2533_vm0, %v2534_v1 }
 0x59a   : > { %2019 = vmatprep.mubr.msk.f32.mxu0 %vm2533_vm0, %v2534_v1  ;;  %2049 = vmatpush3.bf16.msra.mxu0 %v2048_v40 }
 0x59b   : > { %2050 = vmatprep.subr.bf16.mxu0 %v2532_v0  ;;  %2055 = vmatpush3.bf16.msra.mxu1 %v2054_v47 }
 0x59c   : > { %2056 = vmatprep.subr.bf16.mxu1 %v2532_v0 }
 0x59e   : > { %2052 = vmatpush3.bf16.msra.mxu0 %v2051_v43 }
 0x59f   : > { %2058 = vmatpush3.bf16.msra.mxu1 %v2057_v49 }
 0x5a0   : > { %2059 = vmatprep.subr.bf16.mxu1 %v2532_v0 }
 0x5a3   : > { %2061 = vmatpush3.bf16.msra.mxu1 %v2060_v52 }
 0x5a4   : > { %2062 = vmatprep.subr.bf16.mxu1 %v2532_v0 }
 0x5a7   : > { %2064 = vmatpush3.bf16.msra.mxu1 %v2063_v2 }
 0x603   : > { %v1309_v19 = vpop.f32.mrb[8].mxu1 }
 0x604   : > { %v2000_v20 = vpop.f32.mrb[9].mxu1 }
 0x667   : > { %v1236_v21 = vpop.f32.mrb[10].mxu0 }
 0x668   : > { %v1310_v22 = vadd.f32 %v1309_v19, %v1236_v21  ;;  %v1995_v23 = vpop.f32.mrb[11].mxu0 }
 0x66b   : > { %v1456_v24 = vpop.f32.mrb[10].mxu1 }
 0x66c   : > { %v1382_v25 = vpop.f32.mrb[12].mxu0  ;;  %v2010_v26 = vpop.f32.mrb[11].mxu1 }
 0x66d   : > { %v1386_v27 = vadd.f32 %v1382_v25, %v1310_v22  ;;  %v2005_v28 = vpop.f32.mrb[13].mxu0 }
 0x66f   : > { %v1460_v30 = vadd.f32 %v1456_v24, %v1386_v27  ;;  %v1892_v24 = vld [vmem:[#allocation14 + $0x5] ss:$0 sm:$0xff] }
 0x671   : > { %v1466_v31 = vadd.f32 %v1884_v29, %v1460_v30 }
 0x673   : > { %v1467_v32 = vadd.f32 %v1466_v31, %v2896_v8 }
 0x675   : > { %v1470_v33 = vsel %vm429_vm1, %v1467_v32, 0.0 }
 0x676   : > { %1471 = vadd.xlane.f32.xlu1 %v1470_v33 }
 0x703   : > { %v1472_v34 = vpop.xlane.xlu1 %1471 }
 0x704   : > { %v1474_v1 = vmul.f32 0.03125, %v1472_v34 }
 0x706   : > { %v1475_v35 = vsub.f32 %v1467_v32, %v1474_v1 }
 0x708   : > { %v1476_v36 = vmul.f32 %v1475_v35, %v1475_v35 }
 0x70a   : > { %v1477_v37 = vsel %vm429_vm1, %v1476_v36, 0.0 }
 0x70b   : > { %1478 = vadd.xlane.f32.xlu0 %v1477_v37 }
 0x798   : > { %v1479_v53 = vpop.xlane.xlu0 %1478 }
 0x799   : > { %v1480_v54 = vmul.f32 0.03125, %v1479_v53 }
 0x79b   : > { %v1481_v55 = vadd.f32 1e-05, %v1480_v54 }
 0x79d   : > { %2208 = vrsqrt.f32 %v1481_v55 }
 0x7a7   : > { %v2209_v56 = vpop.eup %2208 }
 0x7a8   : > { %v1483_v58 = vmul.f32 %v2209_v56, %v1475_v35 }
 0x7aa   : > { %v1488_v60 = vmul.f32 %v1885_v57, %v1483_v58 }
 0x7ac   : > { %v1493_v61 = vadd.f32 %v1886_v59, %v1488_v60 }
 0x7ae   : > { %2020 = vmatmul.mubr.msk.f32.vlgmr.msra.gmra.mrb[14].mxu0 %vm429_vm1, %v1493_v61 }
 0x881   : > { %v1574_v4 = vpop.f32.mrb[14].mxu0 }
 0x882   : > { %v1575_v5 = vadd.f32 %v1887_v3, %v1574_v4  ;;  %v2021_v0 = vpop.f32.mrb[15].mxu0 }
 0x884   : > { %v1578_v6 = vmax.f32 %v1575_v5, 0.0 }
 0x886   : > { %2039 = vmatmul.mubr.msk.f32.vlgmr.msra.gmra.mrb[12].mxu1 %vm1592_vm3, %v1578_v6 }
 0x959   : > { %v1662_v9 = vpop.f32.mrb[12].mxu1 }
 0x95a   : > { %v1663_v10 = vadd.f32 %v1889_v7, %v1662_v9  ;;  %v2040_v11 = vpop.f32.mrb[13].mxu1 }
 0x95c   : > { %v1666_v12 = vadd.f32 %v1663_v10, %v2896_v8  ;;  %v1891_v8 = vld [vmem:[#allocation14 + $0x4] ss:$0 sm:$0xff] }
 0x95e   : > { %v1669_v13 = vsel %vm429_vm1, %v1666_v12, 0.0 }
 0x95f   : > { %1670 = vadd.xlane.f32.xlu0 %v1669_v13 }
 0x9ec   : > { %v1671_v14 = vpop.xlane.xlu0 %1670 }
 0x9ed   : > { %v1672_v15 = vmul.f32 0.03125, %v1671_v14 }
 0x9ef   : > { %v1673_v16 = vsub.f32 %v1666_v12, %v1672_v15 }
 0x9f1   : > { %v1674_v17 = vmul.f32 %v1673_v16, %v1673_v16 }
 0x9f3   : > { %v1675_v18 = vsel %vm429_vm1, %v1674_v17, 0.0 }
 0x9f4   : > { %1676 = vadd.xlane.f32.xlu1 %v1675_v18 }
 0xa81   : > { %v1677_v19 = vpop.xlane.xlu1 %1676 }
 0xa82   : > { %v1678_v20 = vmul.f32 0.03125, %v1677_v19 }
 0xa84   : > { %v1679_v21 = vadd.f32 1e-05, %v1678_v20 }
 0xa86   : > { %2210 = vrsqrt.f32 %v1679_v21 }
 0xa90   : > { %v2211_v22 = vpop.eup %2210 }
 0xa91   : > { %v1681_v23 = vmul.f32 %v2211_v22, %v1673_v16 }
 0xa93   : > { %v1686_v25 = vmul.f32 %v1891_v8, %v1681_v23 }
 0xa95   : > { %v1691_v26 = vadd.f32 %v1892_v24, %v1686_v25 }
 0xa97   : > { %1692 = vst.msk [vmem:[%s416_s21] sm:$0xff] %vm429_vm1, %v1691_v26 }
 0xa98   : > { %2451 = shalt.err (!%p2448_p10)
}
 0xa99   : > { %s2452_s9 = scalar_lea.hbm %s2994_s10, 128  ;;  %s2456_s20 = scalar_lea.hbm %s3047_s8, 256 }
 0xa9a   : > { %p2453_p11 = scmp.ne.s32.totalorder %s2994_s10, %s2452_s9  ;;  %p2457_p9 = scmp.lt.u32.totalorder %s2994_s10, %s3047_s8 }
 0xa9b   : > { %p2458_p7 = scmp.lt.u32.totalorder %s2456_s20, %s2452_s9  ;;  %p2460_p12 = scmp.lt.u32.totalorder %s2452_s9, %s2994_s10 }
 0xa9c   : > { %p2454_p8 = pnand %p2453_p11, %p3073_p13 }
 0xa9d   : > { %p2459_p4 = por %p2458_p7, %p2457_p9 }
 0xa9e   : > { %p2455_p5 = pneg %p2454_p8 }
 0xa9f   : > { %p2461_p1 = por %p2460_p12, %p2459_p4 }
 0xaa1   : > { %p2462_p3 = pnand %p2461_p1, %p2455_p5 }
 0xaa3   : > { %2465 = shalt.err (!%p2462_p3)
}
 0xaa4   : > { %2095 = dma.vmem_to_hbm [thread:$0]  (%p3073_p13), %s2996_s18, 128, %s2994_s10, %s1694_s16  }
 0xaa5 PF: > { %s1719_s22 = sand.u32 1, %s2508_s27   ;;  %p3074_p2 = scmp.ne.s32.totalorder %s3062_s24, 0 }
 0xaa6   : > { %p3075_p0 = scmp.ge.s32.totalorder %s2520_s30, 2  ;;  %s1720_s26 = scalar_lea.sflag [#allocation4], %s1719_s22 }
 0xaa8   : > { %p2124_p6 = pnand %p3075_p0, %p3074_p2 }
 0xaaa   : > { %2503 = dma.done.wait (!%p2124_p6), %s1720_s26, 128  }
 0xaab   : > { %2505 = vsyncadd (!%p2124_p6), %s1720_s26, 4294967168  ;;  %p25_p10 = scmp.ge.s32.totalorder %s2793_s15, 4   ;;  %s3076_s27 = smov %s2512_s28 }
 0xaac   : > { %s3077_s28 = smov %s2516_s29  ;;  %s3078_s29 = smov %s2805_s1 }
 0xaad   : > { %s3079_s30 = smov %s2793_s15  ;;  %27 = sbr.rel (!%p25_p10) target bundleno = 11 (0xb), region = 125 }
 0xab4   :  { %1725 = vsyncpa [#allocation3], 1 }
 0xab5   :  { %1727 = vsyncpa [#allocation3 + $0x1], 1 }
 0xab6   :  { %1728 = vsyncpa [#allocation6], 1 }
 0xab7   :  { %1729 = vsyncpa [#allocation9], 1 }
 0xab8   :  { %1730 = vsyncpa [#allocation12], 1 }
 0xab9   :  { %1731 = vsyncpa [#allocation15], 1 }
 0xaba   :  { %1732 = vsyncpa [#allocation4], 1 }
 0xabb   :  { %1734 = vsyncpa [#allocation4 + $0x1], 1 }

</bundles_post_ra>
